<compile_context>
chip_gen: v6e
topology: v6e:2x2x1
jax: 0.10.0
libtpu: 0.0.40
codegen_flags: <defaults>
</compile_context>

<pallas_src>
import math

import jax
import jax.numpy as jnp
from jax.experimental import pallas as pl
from jax.experimental.pallas import tpu as pltpu

GRIDLESS_MAX_BYTES = 256 * 1024          # below this: one resident VMEM block, no grid
_VMEM_LIMIT_CAP = 48 * 1024 * 1024       # stay well inside v7x's 64 MiB per-TC VMEM
_TARGET_BLOCK_BYTES = None               # lazily derived from the hardware


def _target_block_bytes() -> int:
    """Per-operand block-size target derived from actual VMEM capacity.
    128-MiB parts (v5e/v6e) get 2-MiB blocks, 64-MiB parts (v7x) get 1 MiB."""
    global _TARGET_BLOCK_BYTES
    if _TARGET_BLOCK_BYTES is None:
        try:
            cap = int(pltpu.get_tpu_info().vmem_capacity_bytes)
        except Exception:                  # no TPU / older jax: conservative default
            cap = 64 * 1024 * 1024
        _TARGET_BLOCK_BYTES = (2 << 20) if cap >= (96 << 20) else (1 << 20)
    return _TARGET_BLOCK_BYTES


def _flatten_lane_dense(total: int):
    """Widest lane-dense last dim (multiple of 128) that divides `total`."""
    assert total % 128 == 0, "state size must be divisible by 128 lanes"
    for w in (1024, 512, 256, 128):
        if total % w == 0:
            return total // w, w
    return total // 128, 128  # unreachable given the assert


def fused_update(arrays, coefs, *, clamp=False, donate=False):
    """out = sum_k coefs[k] * arrays[k]   (optionally clamped to [-1, 1]).

    `coefs` are trace-time Python floats, so every call builds a kernel
    specialized to exactly the operands it needs (zero-coefficient operands
    are dropped, the clamp is only emitted when requested).  Operands stay in
    their native dtype; accumulation is in f32; the output dtype matches
    arrays[0].  `donate=True` promises the operands are dead after this call,
    so the first kept operand's buffer is aliased to the output.
    """
    out_shape = arrays[0].shape
    out_dtype = jnp.dtype(arrays[0].dtype)
    total = arrays[0].size

    kept = [(float(c), a) for c, a in zip(coefs, arrays) if float(c) != 0.0]
    if not kept:                                   # degenerate: keep one operand
        kept = [(0.0, arrays[0])]
    kcoefs = tuple(c for c, _ in kept)

    rows, lane_w = _flatten_lane_dense(total)
    operands = [a.reshape(rows, lane_w) for _, a in kept]   # native dtype, no host cast

    in_itembytes = [jnp.dtype(a.dtype).itemsize for a in operands]
    out_itembytes = out_dtype.itemsize
    state_bytes = rows * lane_w * max(in_itembytes + [out_itembytes])
    gridded = state_bytes > GRIDLESS_MAX_BYTES
    do_clamp = bool(clamp)

    def kernel(*refs):
        in_refs, o_ref = refs[:-1], refs[-1]
        acc = kcoefs[0] * in_refs[0][...].astype(jnp.float32)
        for c, r in zip(kcoefs[1:], in_refs[1:]):
            acc = acc + c * r[...].astype(jnp.float32)
        if do_clamp:
            acc = jnp.clip(acc, -1.0, 1.0)
        o_ref[...] = acc.astype(o_ref.dtype)

    io_alias = {}
    if donate and jnp.dtype(operands[0].dtype) == out_dtype:
        io_alias = {0: 0}                          # in-place state update

    if not gridded:
        # Small state: single lane-dense VMEM-resident block, no grid machinery.
        vspec = pl.BlockSpec(memory_space=pltpu.MemorySpace.VMEM)
        out = pl.pallas_call(
            kernel,
            out_shape=jax.ShapeDtypeStruct((rows, lane_w), out_dtype),
            in_specs=[vspec] * len(operands),
            out_specs=vspec,
            input_output_aliases=io_alias,
        )(*operands)
        return out.reshape(out_shape)

    # ---- gridded streaming path (large states) --------------------------------
    # Target-bytes block on a pl.cdiv grid: never degrades to tiny blocks when
    # `rows` factorizes badly.  block_rows stays a multiple of 16 so bf16
    # operands remain sublane-packed.
    row_bytes = lane_w * max(in_itembytes)
    target_rows = max(16, _target_block_bytes() // row_bytes)
    block_rows = max(16, min(rows, (target_rows // 16) * 16))
    n_blocks = pl.cdiv(rows, block_rows)
    if n_blocks > 1 and n_blocks % 2:
        # Prefer an even block count so v7x's two TensorCores split evenly.
        block_rows = max(16, ((pl.cdiv(rows, n_blocks + 1) + 15) // 16) * 16)
        n_blocks = pl.cdiv(rows, block_rows)

    # VMEM budget from the actual double-buffered pipeline footprint
    # (inputs + output) plus f32 compute slack, capped for v7x's 64 MiB VMEM.
    blk_elems = block_rows * lane_w
    pipeline_bytes = 2 * (sum(blk_elems * b for b in in_itembytes)
                          + blk_elems * out_itembytes)
    vmem_limit = int(min(max(pipeline_bytes + 4 * blk_elems * 4 + (4 << 20),
                             16 << 20),
                         _VMEM_LIMIT_CAP))

    spec = pl.BlockSpec((block_rows, lane_w), lambda i: (i, 0))
    out = pl.pallas_call(
        kernel,
        out_shape=jax.ShapeDtypeStruct((rows, lane_w), out_dtype),
        grid=(n_blocks,),
        in_specs=[spec] * len(operands),
        out_specs=spec,
        input_output_aliases=io_alias,
        compiler_params=pltpu.CompilerParams(
            dimension_semantics=("parallel",),
            vmem_limit_bytes=vmem_limit),
    )(*operands)
    return out.reshape(out_shape)


# ----------------------------------------------------------------------------
# Sampler (scalar schedule math on the host, tensor math in Pallas kernels)
# ----------------------------------------------------------------------------
def get_sigmas(sigma: float, sigma_next: float, eta: float = 1.0):
    sigma_up = min(
        sigma_next,
        eta * (sigma_next ** 2 * (sigma ** 2 - sigma_next ** 2) / sigma ** 2) ** 0.5,
    )
    sigma_down = (sigma_next ** 2 - sigma_up ** 2) ** 0.5
    return sigma_up, sigma_down


class DPMPPSDESampler:
    """'DPM++ SDE Karras' stochastic sampler; all per-step tensor updates run as
    fused Pallas TPU kernels, traced once under a single jax.jit."""

    def __init__(self, num_steps: int = 8, cond_scale: float = 1.0,
                 eta: float = 1.0, rho: float = 0.5, noise_seed: int = 1234):
        self.num_steps = num_steps
        self.cond_scale = cond_scale
        self.eta = eta
        self.rho = rho
        self.noise_seed = noise_seed

    def step(self, x, fn, net, noise_key, sigma: float, sigma_next: float, *,
             clamp_output: bool = False, **kwargs):
        denoised = fn(x, net=net, sigma=sigma, inference=True,
                      cond_scale=self.cond_scale, **kwargs)
        if sigma_next == 0.0:
            # Euler: x = x + (x - denoised)/sigma * (sigma_next - sigma)
            dt = sigma_next - sigma
            return fused_update([x, denoised], [1.0 + dt / sigma, -dt / sigma],
                                clamp=clamp_output, donate=True)

        t, t_next = -math.log(sigma), -math.log(sigma_next)
        h = t_next - t
        s = t + h * self.rho
        fac = 1.0 / (2.0 * self.rho)

        # ancestral half step:  x_2 = a*x - expm1(t - s_)*denoised + su*noise
        sd, su = get_sigmas(math.exp(-t), math.exp(-s), self.eta)
        s_ = -math.log(sd)
        ops = [x, denoised]
        cfs = [math.exp(-s_) / math.exp(-t), -math.expm1(t - s_)]
        if su != 0.0:
            # TODO(synk): torchsde BrownianTreeNoiseSampler has no JAX/Pallas
            # equivalent; independent folded-key Gaussian noise per half-step.
            n1 = jax.random.normal(jax.random.fold_in(noise_key, 0),
                                   x.shape, x.dtype)
            ops.append(n1)
            cfs.append(su)
        x_2 = fused_update(ops, cfs)

        denoised_2 = fn(x_2, net=net, sigma=math.exp(-s), inference=True,
                        cond_scale=self.cond_scale, **kwargs)

        # full step:  x = a*x - expm1(t - t_next_)*((1-fac)*d + fac*d2) + su*noise
        sd, su = get_sigmas(math.exp(-t), math.exp(-t_next), self.eta)
        t_next_ = -math.log(sd)
        e = math.expm1(t - t_next_)
        ops = [x, denoised, denoised_2]
        cfs = [math.exp(-t_next_) / math.exp(-t), -e * (1.0 - fac), -e * fac]
        if su != 0.0:
            n2 = jax.random.normal(jax.random.fold_in(noise_key, 1),
                                   x.shape, x.dtype)
            ops.append(n2)
            cfs.append(su)
        return fused_update(ops, cfs, clamp=clamp_output, donate=True)

    def forward(self, noise, fn, net, sigmas, **kwargs):
        sig = [float(s) for s in sigmas]      # host-side schedule, read once

        def run(noise):
            # x = sigmas[0] * noise — the denoiser needs the scaled x, so the
            # scale cannot be folded past the first fn() call; under jit this
            # is a single constant scalar multiply.
            x = jnp.asarray(noise, jnp.float32) * sig[0]
            base_key = jax.random.PRNGKey(self.noise_seed)
            n_steps = self.num_steps - 1
            if n_steps <= 0:
                return fused_update([x], [1.0], clamp=True, donate=True)
            for i in range(n_steps):
                x = self.step(x, fn, net, jax.random.fold_in(base_key, i),
                              sig[i], sig[i + 1],
                              clamp_output=(i == n_steps - 1), **kwargs)
            return x

        return jax.jit(run)(noise)


# ----------------------------------------------------------------------------
# Synthetic denoiser (the nn.Module `net` / `fn` are external arguments;
# DPMPPSDESampler itself defines no learnable parameters).
# ----------------------------------------------------------------------------
SIGMA_DATA = 0.5


def synthetic_net(x, sigma: float):
    # EDM-style analytic denoiser: denoised = c_skip(sigma) * x.  `sigma` is a
    # trace-time Python float -> a single constant scalar multiply under jit.
    c_skip = SIGMA_DATA ** 2 / (sigma ** 2 + SIGMA_DATA ** 2)
    return c_skip * x


def synthetic_fn(x, net, sigma, inference=True, cond_scale=1.0, **kwargs):
    return net(x, sigma)


def karras_sigmas(n_nonzero: int, sigma_min: float, sigma_max: float, rho: float = 7.0):
    """Karras schedule as host-side Python floats (length n_nonzero + 1)."""
    if n_nonzero <= 1:
        sig = [float(sigma_max)] * max(n_nonzero, 0)
    else:
        min_inv = sigma_min ** (1.0 / rho)
        max_inv = sigma_max ** (1.0 / rho)
        sig = [(max_inv + (i / (n_nonzero - 1)) * (min_inv - max_inv)) ** rho
               for i in range(n_nonzero)]
    return sig + [0.0]


if __name__ == "__main__":
    num_steps = 8
    key = jax.random.PRNGKey(0)
    # input consistent with an NCHW image denoiser: batch=2, channels=4, 16x16
    noise = jax.random.normal(key, (2, 4, 16, 16), dtype=jnp.float32)
    sigmas = karras_sigmas(num_steps - 1, sigma_min=0.1, sigma_max=10.0)  # len == num_steps

    sampler = DPMPPSDESampler(num_steps=num_steps, cond_scale=1.0, eta=1.0, rho=0.5)
    out = sampler.forward(noise, fn=synthetic_fn, net=synthetic_net, sigmas=sigmas)
    out = jax.block_until_ready(out)

    assert out.shape == noise.shape
    assert bool(jnp.all(jnp.isfinite(out)))
    assert float(jnp.max(jnp.abs(out))) <= 1.0 + 1e-6
    print("KERNEL_OK")
</pallas_src>

<mosaic_0001>
module attributes {stable_mosaic.version = 11 : i64} {
  func.func @kernel(%arg0: memref<2x1024xf32, #tpu.memory_space<vmem>>, %arg1: memref<2x1024xf32, #tpu.memory_space<vmem>>, %arg2: memref<2x1024xf32, #tpu.memory_space<vmem>>, %arg3: memref<2x1024xf32, #tpu.memory_space<vmem>>) attributes {dimension_semantics = [], scalar_prefetch = 0 : i64, scratch_operands = 0 : i64, tpu.core_type = #tpu.core_type<tc>} {
    %c0 = arith.constant 0 : index
    %c0_0 = arith.constant 0 : index
    %0 = vector.load %arg0[%c0, %c0_0] : memref<2x1024xf32, #tpu.memory_space<vmem>>, vector<2x1024xf32>
    %cst = arith.constant 0.496809274 : f32
    %1 = vector.broadcast %cst : f32 to vector<2x1024xf32>
    %2 = arith.mulf %1, %0 : vector<2x1024xf32>
    %c0_1 = arith.constant 0 : index
    %c0_2 = arith.constant 0 : index
    %3 = vector.load %arg1[%c0_1, %c0_2] : memref<2x1024xf32, #tpu.memory_space<vmem>>, vector<2x1024xf32>
    %cst_3 = arith.constant 0.503190696 : f32
    %4 = vector.broadcast %cst_3 : f32 to vector<2x1024xf32>
    %5 = arith.mulf %4, %3 : vector<2x1024xf32>
    %6 = arith.addf %2, %5 : vector<2x1024xf32>
    %c0_4 = arith.constant 0 : index
    %c0_5 = arith.constant 0 : index
    %7 = vector.load %arg2[%c0_4, %c0_5] : memref<2x1024xf32, #tpu.memory_space<vmem>>, vector<2x1024xf32>
    %cst_6 = arith.constant 5.56396246 : f32
    %8 = vector.broadcast %cst_6 : f32 to vector<2x1024xf32>
    %9 = arith.mulf %8, %7 : vector<2x1024xf32>
    %10 = arith.addf %6, %9 : vector<2x1024xf32>
    %c0_7 = arith.constant 0 : index
    %c0_8 = arith.constant 0 : index
    %11 = vector.load %arg3[%c0_7, %c0_8] : memref<2x1024xf32, #tpu.memory_space<vmem>>, vector<2x1024xf32>
    tpu.vector_store %arg3[%c0_7, %c0_8], %10 {strides = array<i32>} : memref<2x1024xf32, #tpu.memory_space<vmem>>, vector<2x1024xf32>,
    return
  }
}

module attributes {stable_mosaic.version = 11 : i64} {
  func.func @kernel(%arg0: memref<2x1024xf32, #tpu.memory_space<vmem>>, %arg1: memref<2x1024xf32, #tpu.memory_space<vmem>>, %arg2: memref<2x1024xf32, #tpu.memory_space<vmem>>, %arg3: memref<2x1024xf32, #tpu.memory_space<vmem>>) attributes {dimension_semantics = [], scalar_prefetch = 0 : i64, scratch_operands = 0 : i64, tpu.core_type = #tpu.core_type<tc>} {
    %c0 = arith.constant 0 : index
    %c0_0 = arith.constant 0 : index
    %0 = vector.load %arg0[%c0, %c0_0] : memref<2x1024xf32, #tpu.memory_space<vmem>>, vector<2x1024xf32>
    %cst = arith.constant 0.462319136 : f32
    %1 = vector.broadcast %cst : f32 to vector<2x1024xf32>
    %2 = arith.mulf %1, %0 : vector<2x1024xf32>
    %c0_1 = arith.constant 0 : index
    %c0_2 = arith.constant 0 : index
    %3 = vector.load %arg1[%c0_1, %c0_2] : memref<2x1024xf32, #tpu.memory_space<vmem>>, vector<2x1024xf32>
    %cst_3 = arith.constant 0.537680864 : f32
    %4 = vector.broadcast %cst_3 : f32 to vector<2x1024xf32>
    %5 = arith.mulf %4, %3 : vector<2x1024xf32>
    %6 = arith.addf %2, %5 : vector<2x1024xf32>
    %c0_4 = arith.constant 0 : index
    %c0_5 = arith.constant 0 : index
    %7 = vector.load %arg2[%c0_4, %c0_5] : memref<2x1024xf32, #tpu.memory_space<vmem>>, vector<2x1024xf32>
    %cst_6 = arith.constant 3.09576774 : f32
    %8 = vector.broadcast %cst_6 : f32 to vector<2x1024xf32>
    %9 = arith.mulf %8, %7 : vector<2x1024xf32>
    %10 = arith.addf %6, %9 : vector<2x1024xf32>
    %c0_7 = arith.constant 0 : index
    %c0_8 = arith.constant 0 : index
    %11 = vector.load %arg3[%c0_7, %c0_8] : memref<2x1024xf32, #tpu.memory_space<vmem>>, vector<2x1024xf32>
    tpu.vector_store %arg3[%c0_7, %c0_8], %10 {strides = array<i32>} : memref<2x1024xf32, #tpu.memory_space<vmem>>, vector<2x1024xf32>,
    return
  }
}

module attributes {stable_mosaic.version = 11 : i64} {
  func.func @kernel(%arg0: memref<2x1024xf32, #tpu.memory_space<vmem>>, %arg1: memref<2x1024xf32, #tpu.memory_space<vmem>>, %arg2: memref<2x1024xf32, #tpu.memory_space<vmem>>, %arg3: memref<2x1024xf32, #tpu.memory_space<vmem>>) attributes {dimension_semantics = [], scalar_prefetch = 0 : i64, scratch_operands = 0 : i64, tpu.core_type = #tpu.core_type<tc>} {
    %c0 = arith.constant 0 : index
    %c0_0 = arith.constant 0 : index
    %0 = vector.load %arg0[%c0, %c0_0] : memref<2x1024xf32, #tpu.memory_space<vmem>>, vector<2x1024xf32>
    %cst = arith.constant 0.499251753 : f32
    %1 = vector.broadcast %cst : f32 to vector<2x1024xf32>
    %2 = arith.mulf %1, %0 : vector<2x1024xf32>
    %c0_1 = arith.constant 0 : index
    %c0_2 = arith.constant 0 : index
    %3 = vector.load %arg1[%c0_1, %c0_2] : memref<2x1024xf32, #tpu.memory_space<vmem>>, vector<2x1024xf32>
    %cst_3 = arith.constant 0.500748217 : f32
    %4 = vector.broadcast %cst_3 : f32 to vector<2x1024xf32>
    %5 = arith.mulf %4, %3 : vector<2x1024xf32>
    %6 = arith.addf %2, %5 : vector<2x1024xf32>
    %c0_4 = arith.constant 0 : index
    %c0_5 = arith.constant 0 : index
    %7 = vector.load %arg2[%c0_4, %c0_5] : memref<2x1024xf32, #tpu.memory_space<vmem>>, vector<2x1024xf32>
    %cst_6 = arith.constant 2.934120e+00 : f32
    %8 = vector.broadcast %cst_6 : f32 to vector<2x1024xf32>
    %9 = arith.mulf %8, %7 : vector<2x1024xf32>
    %10 = arith.addf %6, %9 : vector<2x1024xf32>
    %c0_7 = arith.constant 0 : index
    %c0_8 = arith.constant 0 : index
    %11 = vector.load %arg3[%c0_7, %c0_8] : memref<2x1024xf32, #tpu.memory_space<vmem>>, vector<2x1024xf32>
    tpu.vector_store %arg3[%c0_7, %c0_8], %10 {strides = array<i32>} : memref<2x1024xf32, #tpu.memory_space<vmem>>, vector<2x1024xf32>,
    return
  }
}

module attributes {stable_mosaic.version = 11 : i64} {
  func.func @kernel(%arg0: memref<2x1024xf32, #tpu.memory_space<vmem>>, %arg1: memref<2x1024xf32, #tpu.memory_space<vmem>>, %arg2: memref<2x1024xf32, #tpu.memory_space<vmem>>, %arg3: memref<2x1024xf32, #tpu.memory_space<vmem>>) attributes {dimension_semantics = [], scalar_prefetch = 0 : i64, scratch_operands = 0 : i64, tpu.core_type = #tpu.core_type<tc>} {
    %c0 = arith.constant 0 : index
    %c0_0 = arith.constant 0 : index
    %0 = vector.load %arg0[%c0, %c0_0] : memref<2x1024xf32, #tpu.memory_space<vmem>>, vector<2x1024xf32>
    %cst = arith.constant 0.448058605 : f32
    %1 = vector.broadcast %cst : f32 to vector<2x1024xf32>
    %2 = arith.mulf %1, %0 : vector<2x1024xf32>
    %c0_1 = arith.constant 0 : index
    %c0_2 = arith.constant 0 : index
    %3 = vector.load %arg1[%c0_1, %c0_2] : memref<2x1024xf32, #tpu.memory_space<vmem>>, vector<2x1024xf32>
    %cst_3 = arith.constant 0.551941395 : f32
    %4 = vector.broadcast %cst_3 : f32 to vector<2x1024xf32>
    %5 = arith.mulf %4, %3 : vector<2x1024xf32>
    %6 = arith.addf %2, %5 : vector<2x1024xf32>
    %c0_4 = arith.constant 0 : index
    %c0_5 = arith.constant 0 : index
    %7 = vector.load %arg2[%c0_4, %c0_5] : memref<2x1024xf32, #tpu.memory_space<vmem>>, vector<2x1024xf32>
    %cst_6 = arith.constant 1.54728949 : f32
    %8 = vector.broadcast %cst_6 : f32 to vector<2x1024xf32>
    %9 = arith.mulf %8, %7 : vector<2x1024xf32>
    %10 = arith.addf %6, %9 : vector<2x1024xf32>
    %c0_7 = arith.constant 0 : index
    %c0_8 = arith.constant 0 : index
    %11 = vector.load %arg3[%c0_7, %c0_8] : memref<2x1024xf32, #tpu.memory_space<vmem>>, vector<2x1024xf32>
    tpu.vector_store %arg3[%c0_7, %c0_8], %10 {strides = array<i32>} : memref<2x1024xf32, #tpu.memory_space<vmem>>, vector<2x1024xf32>,
    return
  }
}

module attributes {stable_mosaic.version = 11 : i64} {
  func.func @kernel(%arg0: memref<2x1024xf32, #tpu.memory_space<vmem>>, %arg1: memref<2x1024xf32, #tpu.memory_space<vmem>>, %arg2: memref<2x1024xf32, #tpu.memory_space<vmem>>, %arg3: memref<2x1024xf32, #tpu.memory_space<vmem>>) attributes {dimension_semantics = [], scalar_prefetch = 0 : i64, scratch_operands = 0 : i64, tpu.core_type = #tpu.core_type<tc>} {
    %c0 = arith.constant 0 : index
    %c0_0 = arith.constant 0 : index
    %0 = vector.load %arg0[%c0, %c0_0] : memref<2x1024xf32, #tpu.memory_space<vmem>>, vector<2x1024xf32>
    %cst = arith.constant 0.499969035 : f32
    %1 = vector.broadcast %cst : f32 to vector<2x1024xf32>
    %2 = arith.mulf %1, %0 : vector<2x1024xf32>
    %c0_1 = arith.constant 0 : index
    %c0_2 = arith.constant 0 : index
    %3 = vector.load %arg1[%c0_1, %c0_2] : memref<2x1024xf32, #tpu.memory_space<vmem>>, vector<2x1024xf32>
    %cst_3 = arith.constant 5.000310e-01 : f32
    %4 = vector.broadcast %cst_3 : f32 to vector<2x1024xf32>
    %5 = arith.mulf %4, %3 : vector<2x1024xf32>
    %6 = arith.addf %2, %5 : vector<2x1024xf32>
    %c0_4 = arith.constant 0 : index
    %c0_5 = arith.constant 0 : index
    %7 = vector.load %arg2[%c0_4, %c0_5] : memref<2x1024xf32, #tpu.memory_space<vmem>>, vector<2x1024xf32>
    %cst_6 = arith.constant 1.45073211 : f32
    %8 = vector.broadcast %cst_6 : f32 to vector<2x1024xf32>
    %9 = arith.mulf %8, %7 : vector<2x1024xf32>
    %10 = arith.addf %6, %9 : vector<2x1024xf32>
    %c0_7 = arith.constant 0 : index
    %c0_8 = arith.constant 0 : index
    %11 = vector.load %arg3[%c0_7, %c0_8] : memref<2x1024xf32, #tpu.memory_space<vmem>>, vector<2x1024xf32>
    tpu.vector_store %arg3[%c0_7, %c0_8], %10 {strides = array<i32>} : memref<2x1024xf32, #tpu.memory_space<vmem>>, vector<2x1024xf32>,
    return
  }
}

module attributes {stable_mosaic.version = 11 : i64} {
  func.func @kernel(%arg0: memref<2x1024xf32, #tpu.memory_space<vmem>>, %arg1: memref<2x1024xf32, #tpu.memory_space<vmem>>, %arg2: memref<2x1024xf32, #tpu.memory_space<vmem>>, %arg3: memref<2x1024xf32, #tpu.memory_space<vmem>>) attributes {dimension_semantics = [], scalar_prefetch = 0 : i64, scratch_operands = 0 : i64, tpu.core_type = #tpu.core_type<tc>} {
    %c0 = arith.constant 0 : index
    %c0_0 = arith.constant 0 : index
    %0 = vector.load %arg0[%c0, %c0_0] : memref<2x1024xf32, #tpu.memory_space<vmem>>, vector<2x1024xf32>
    %cst = arith.constant 0.429770231 : f32
    %1 = vector.broadcast %cst : f32 to vector<2x1024xf32>
    %2 = arith.mulf %1, %0 : vector<2x1024xf32>
    %c0_1 = arith.constant 0 : index
    %c0_2 = arith.constant 0 : index
    %3 = vector.load %arg1[%c0_1, %c0_2] : memref<2x1024xf32, #tpu.memory_space<vmem>>, vector<2x1024xf32>
    %cst_3 = arith.constant 0.570229769 : f32
    %4 = vector.broadcast %cst_3 : f32 to vector<2x1024xf32>
    %5 = arith.mulf %4, %3 : vector<2x1024xf32>
    %6 = arith.addf %2, %5 : vector<2x1024xf32>
    %c0_4 = arith.constant 0 : index
    %c0_5 = arith.constant 0 : index
    %7 = vector.load %arg2[%c0_4, %c0_5] : memref<2x1024xf32, #tpu.memory_space<vmem>>, vector<2x1024xf32>
    %cst_6 = arith.constant 0.717292964 : f32
    %8 = vector.broadcast %cst_6 : f32 to vector<2x1024xf32>
    %9 = arith.mulf %8, %7 : vector<2x1024xf32>
    %10 = arith.addf %6, %9 : vector<2x1024xf32>
    %c0_7 = arith.constant 0 : index
    %c0_8 = arith.constant 0 : index
    %11 = vector.load %arg3[%c0_7, %c0_8] : memref<2x1024xf32, #tpu.memory_space<vmem>>, vector<2x1024xf32>
    tpu.vector_store %arg3[%c0_7, %c0_8], %10 {strides = array<i32>} : memref<2x1024xf32, #tpu.memory_space<vmem>>, vector<2x1024xf32>,
    return
  }
}

module attributes {stable_mosaic.version = 11 : i64} {
  func.func @kernel(%arg0: memref<2x1024xf32, #tpu.memory_space<vmem>>, %arg1: memref<2x1024xf32, #tpu.memory_space<vmem>>, %arg2: memref<2x1024xf32, #tpu.memory_space<vmem>>, %arg3: memref<2x1024xf32, #tpu.memory_space<vmem>>) attributes {dimension_semantics = [], scalar_prefetch = 0 : i64, scratch_operands = 0 : i64, tpu.core_type = #tpu.core_type<tc>} {
    %c0 = arith.constant 0 : index
    %c0_0 = arith.constant 0 : index
    %0 = vector.load %arg0[%c0, %c0_0] : memref<2x1024xf32, #tpu.memory_space<vmem>>, vector<2x1024xf32>
    %cst = arith.constant 0.498141676 : f32
    %1 = vector.broadcast %cst : f32 to vector<2x1024xf32>
    %2 = arith.mulf %1, %0 : vector<2x1024xf32>
    %c0_1 = arith.constant 0 : index
    %c0_2 = arith.constant 0 : index
    %3 = vector.load %arg1[%c0_1, %c0_2] : memref<2x1024xf32, #tpu.memory_space<vmem>>, vector<2x1024xf32>
    %cst_3 = arith.constant 0.501858294 : f32
    %4 = vector.broadcast %cst_3 : f32 to vector<2x1024xf32>
    %5 = arith.mulf %4, %3 : vector<2x1024xf32>
    %6 = arith.addf %2, %5 : vector<2x1024xf32>
    %c0_4 = arith.constant 0 : index
    %c0_5 = arith.constant 0 : index
    %7 = vector.load %arg2[%c0_4, %c0_5] : memref<2x1024xf32, #tpu.memory_space<vmem>>, vector<2x1024xf32>
    %cst_6 = arith.constant 0.662885844 : f32
    %8 = vector.broadcast %cst_6 : f32 to vector<2x1024xf32>
    %9 = arith.mulf %8, %7 : vector<2x1024xf32>
    %10 = arith.addf %6, %9 : vector<2x1024xf32>
    %c0_7 = arith.constant 0 : index
    %c0_8 = arith.constant 0 : index
    %11 = vector.load %arg3[%c0_7, %c0_8] : memref<2x1024xf32, #tpu.memory_space<vmem>>, vector<2x1024xf32>
    tpu.vector_store %arg3[%c0_7, %c0_8], %10 {strides = array<i32>} : memref<2x1024xf32, #tpu.memory_space<vmem>>, vector<2x1024xf32>,
    return
  }
}

module attributes {stable_mosaic.version = 11 : i64} {
  func.func @kernel(%arg0: memref<2x1024xf32, #tpu.memory_space<vmem>>, %arg1: memref<2x1024xf32, #tpu.memory_space<vmem>>, %arg2: memref<2x1024xf32, #tpu.memory_space<vmem>>, %arg3: memref<2x1024xf32, #tpu.memory_space<vmem>>) attributes {dimension_semantics = [], scalar_prefetch = 0 : i64, scratch_operands = 0 : i64, tpu.core_type = #tpu.core_type<tc>} {
    %c0 = arith.constant 0 : index
    %c0_0 = arith.constant 0 : index
    %0 = vector.load %arg0[%c0, %c0_0] : memref<2x1024xf32, #tpu.memory_space<vmem>>, vector<2x1024xf32>
    %cst = arith.constant 0.406441718 : f32
    %1 = vector.broadcast %cst : f32 to vector<2x1024xf32>
    %2 = arith.mulf %1, %0 : vector<2x1024xf32>
    %c0_1 = arith.constant 0 : index
    %c0_2 = arith.constant 0 : index
    %3 = vector.load %arg1[%c0_1, %c0_2] : memref<2x1024xf32, #tpu.memory_space<vmem>>, vector<2x1024xf32>
    %cst_3 = arith.constant 0.593558252 : f32
    %4 = vector.broadcast %cst_3 : f32 to vector<2x1024xf32>
    %5 = arith.mulf %4, %3 : vector<2x1024xf32>
    %6 = arith.addf %2, %5 : vector<2x1024xf32>
    %c0_4 = arith.constant 0 : index
    %c0_5 = arith.constant 0 : index
    %7 = vector.load %arg2[%c0_4, %c0_5] : memref<2x1024xf32, #tpu.memory_space<vmem>>, vector<2x1024xf32>
    %cst_6 = arith.constant 0.302893728 : f32
    %8 = vector.broadcast %cst_6 : f32 to vector<2x1024xf32>
    %9 = arith.mulf %8, %7 : vector<2x1024xf32>
    %10 = arith.addf %6, %9 : vector<2x1024xf32>
    %c0_7 = arith.constant 0 : index
    %c0_8 = arith.constant 0 : index
    %11 = vector.load %arg3[%c0_7, %c0_8] : memref<2x1024xf32, #tpu.memory_space<vmem>>, vector<2x1024xf32>
    tpu.vector_store %arg3[%c0_7, %c0_8], %10 {strides = array<i32>} : memref<2x1024xf32, #tpu.memory_space<vmem>>, vector<2x1024xf32>,
    return
  }
}

module attributes {stable_mosaic.version = 11 : i64} {
  func.func @kernel(%arg0: memref<2x1024xf32, #tpu.memory_space<vmem>>, %arg1: memref<2x1024xf32, #tpu.memory_space<vmem>>, %arg2: memref<2x1024xf32, #tpu.memory_space<vmem>>, %arg3: memref<2x1024xf32, #tpu.memory_space<vmem>>) attributes {dimension_semantics = [], scalar_prefetch = 0 : i64, scratch_operands = 0 : i64, tpu.core_type = #tpu.core_type<tc>} {
    %c0 = arith.constant 0 : index
    %c0_0 = arith.constant 0 : index
    %0 = vector.load %arg0[%c0, %c0_0] : memref<2x1024xf32, #tpu.memory_space<vmem>>, vector<2x1024xf32>
    %cst = arith.constant 0.492538631 : f32
    %1 = vector.broadcast %cst : f32 to vector<2x1024xf32>
    %2 = arith.mulf %1, %0 : vector<2x1024xf32>
    %c0_1 = arith.constant 0 : index
    %c0_2 = arith.constant 0 : index
    %3 = vector.load %arg1[%c0_1, %c0_2] : memref<2x1024xf32, #tpu.memory_space<vmem>>, vector<2x1024xf32>
    %cst_3 = arith.constant 0.507461369 : f32
    %4 = vector.broadcast %cst_3 : f32 to vector<2x1024xf32>
    %5 = arith.mulf %4, %3 : vector<2x1024xf32>
    %6 = arith.addf %2, %5 : vector<2x1024xf32>
    %c0_4 = arith.constant 0 : index
    %c0_5 = arith.constant 0 : index
    %7 = vector.load %arg2[%c0_4, %c0_5] : memref<2x1024xf32, #tpu.memory_space<vmem>>, vector<2x1024xf32>
    %cst_6 = arith.constant 0.274397373 : f32
    %8 = vector.broadcast %cst_6 : f32 to vector<2x1024xf32>
    %9 = arith.mulf %8, %7 : vector<2x1024xf32>
    %10 = arith.addf %6, %9 : vector<2x1024xf32>
    %c0_7 = arith.constant 0 : index
    %c0_8 = arith.constant 0 : index
    %11 = vector.load %arg3[%c0_7, %c0_8] : memref<2x1024xf32, #tpu.memory_space<vmem>>, vector<2x1024xf32>
    tpu.vector_store %arg3[%c0_7, %c0_8], %10 {strides = array<i32>} : memref<2x1024xf32, #tpu.memory_space<vmem>>, vector<2x1024xf32>,
    return
  }
}

module attributes {stable_mosaic.version = 11 : i64} {
  func.func @kernel(%arg0: memref<2x1024xf32, #tpu.memory_space<vmem>>, %arg1: memref<2x1024xf32, #tpu.memory_space<vmem>>, %arg2: memref<2x1024xf32, #tpu.memory_space<vmem>>, %arg3: memref<2x1024xf32, #tpu.memory_space<vmem>>) attributes {dimension_semantics = [], scalar_prefetch = 0 : i64, scratch_operands = 0 : i64, tpu.core_type = #tpu.core_type<tc>} {
    %c0 = arith.constant 0 : index
    %c0_0 = arith.constant 0 : index
    %0 = vector.load %arg0[%c0, %c0_0] : memref<2x1024xf32, #tpu.memory_space<vmem>>, vector<2x1024xf32>
    %cst = arith.constant 0.376813918 : f32
    %1 = vector.broadcast %cst : f32 to vector<2x1024xf32>
    %2 = arith.mulf %1, %0 : vector<2x1024xf32>
    %c0_1 = arith.constant 0 : index
    %c0_2 = arith.constant 0 : index
    %3 = vector.load %arg1[%c0_1, %c0_2] : memref<2x1024xf32, #tpu.memory_space<vmem>>, vector<2x1024xf32>
    %cst_3 = arith.constant 0.623186051 : f32
    %4 = vector.broadcast %cst_3 : f32 to vector<2x1024xf32>
    %5 = arith.mulf %4, %3 : vector<2x1024xf32>
    %6 = arith.addf %2, %5 : vector<2x1024xf32>
    %c0_4 = arith.constant 0 : index
    %c0_5 = arith.constant 0 : index
    %7 = vector.load %arg2[%c0_4, %c0_5] : memref<2x1024xf32, #tpu.memory_space<vmem>>, vector<2x1024xf32>
    %cst_6 = arith.constant 0.113585047 : f32
    %8 = vector.broadcast %cst_6 : f32 to vector<2x1024xf32>
    %9 = arith.mulf %8, %7 : vector<2x1024xf32>
    %10 = arith.addf %6, %9 : vector<2x1024xf32>
    %c0_7 = arith.constant 0 : index
    %c0_8 = arith.constant 0 : index
    %11 = vector.load %arg3[%c0_7, %c0_8] : memref<2x1024xf32, #tpu.memory_space<vmem>>, vector<2x1024xf32>
    tpu.vector_store %arg3[%c0_7, %c0_8], %10 {strides = array<i32>} : memref<2x1024xf32, #tpu.memory_space<vmem>>, vector<2x1024xf32>,
    return
  }
}

module attributes {stable_mosaic.version = 11 : i64} {
  func.func @kernel(%arg0: memref<2x1024xf32, #tpu.memory_space<vmem>>, %arg1: memref<2x1024xf32, #tpu.memory_space<vmem>>, %arg2: memref<2x1024xf32, #tpu.memory_space<vmem>>, %arg3: memref<2x1024xf32, #tpu.memory_space<vmem>>) attributes {dimension_semantics = [], scalar_prefetch = 0 : i64, scratch_operands = 0 : i64, tpu.core_type = #tpu.core_type<tc>} {
    %c0 = arith.constant 0 : index
    %c0_0 = arith.constant 0 : index
    %0 = vector.load %arg0[%c0, %c0_0] : memref<2x1024xf32, #tpu.memory_space<vmem>>, vector<2x1024xf32>
    %cst = arith.constant 0.481271356 : f32
    %1 = vector.broadcast %cst : f32 to vector<2x1024xf32>
    %2 = arith.mulf %1, %0 : vector<2x1024xf32>
    %c0_1 = arith.constant 0 : index
    %c0_2 = arith.constant 0 : index
    %3 = vector.load %arg1[%c0_1, %c0_2] : memref<2x1024xf32, #tpu.memory_space<vmem>>, vector<2x1024xf32>
    %cst_3 = arith.constant 0.518728614 : f32
    %4 = vector.broadcast %cst_3 : f32 to vector<2x1024xf32>
    %5 = arith.mulf %4, %3 : vector<2x1024xf32>
    %6 = arith.addf %2, %5 : vector<2x1024xf32>
    %c0_4 = arith.constant 0 : index
    %c0_5 = arith.constant 0 : index
    %7 = vector.load %arg2[%c0_4, %c0_5] : memref<2x1024xf32, #tpu.memory_space<vmem>>, vector<2x1024xf32>
    %cst_6 = arith.constant 1.000000e-01 : f32
    %8 = vector.broadcast %cst_6 : f32 to vector<2x1024xf32>
    %9 = arith.mulf %8, %7 : vector<2x1024xf32>
    %10 = arith.addf %6, %9 : vector<2x1024xf32>
    %c0_7 = arith.constant 0 : index
    %c0_8 = arith.constant 0 : index
    %11 = vector.load %arg3[%c0_7, %c0_8] : memref<2x1024xf32, #tpu.memory_space<vmem>>, vector<2x1024xf32>
    tpu.vector_store %arg3[%c0_7, %c0_8], %10 {strides = array<i32>} : memref<2x1024xf32, #tpu.memory_space<vmem>>, vector<2x1024xf32>,
    return
  }
}

module attributes {stable_mosaic.version = 11 : i64} {
  func.func @kernel(%arg0: memref<2x1024xf32, #tpu.memory_space<vmem>>, %arg1: memref<2x1024xf32, #tpu.memory_space<vmem>>, %arg2: memref<2x1024xf32, #tpu.memory_space<vmem>>, %arg3: memref<2x1024xf32, #tpu.memory_space<vmem>>) attributes {dimension_semantics = [], scalar_prefetch = 0 : i64, scratch_operands = 0 : i64, tpu.core_type = #tpu.core_type<tc>} {
    %c0 = arith.constant 0 : index
    %c0_0 = arith.constant 0 : index
    %0 = vector.load %arg0[%c0, %c0_0] : memref<2x1024xf32, #tpu.memory_space<vmem>>, vector<2x1024xf32>
    %cst = arith.constant 0.339372367 : f32
    %1 = vector.broadcast %cst : f32 to vector<2x1024xf32>
    %2 = arith.mulf %1, %0 : vector<2x1024xf32>
    %c0_1 = arith.constant 0 : index
    %c0_2 = arith.constant 0 : index
    %3 = vector.load %arg1[%c0_1, %c0_2] : memref<2x1024xf32, #tpu.memory_space<vmem>>, vector<2x1024xf32>
    %cst_3 = arith.constant 0.660627663 : f32
    %4 = vector.broadcast %cst_3 : f32 to vector<2x1024xf32>
    %5 = arith.mulf %4, %3 : vector<2x1024xf32>
    %6 = arith.addf %2, %5 : vector<2x1024xf32>
    %c0_4 = arith.constant 0 : index
    %c0_5 = arith.constant 0 : index
    %7 = vector.load %arg2[%c0_4, %c0_5] : memref<2x1024xf32, #tpu.memory_space<vmem>>, vector<2x1024xf32>
    %cst_6 = arith.constant 0.036443498 : f32
    %8 = vector.broadcast %cst_6 : f32 to vector<2x1024xf32>
    %9 = arith.mulf %8, %7 : vector<2x1024xf32>
    %10 = arith.addf %6, %9 : vector<2x1024xf32>
    %c0_7 = arith.constant 0 : index
    %c0_8 = arith.constant 0 : index
    %11 = vector.load %arg3[%c0_7, %c0_8] : memref<2x1024xf32, #tpu.memory_space<vmem>>, vector<2x1024xf32>
    tpu.vector_store %arg3[%c0_7, %c0_8], %10 {strides = array<i32>} : memref<2x1024xf32, #tpu.memory_space<vmem>>, vector<2x1024xf32>,
    return
  }
}

module attributes {stable_mosaic.version = 11 : i64} {
  func.func @kernel(%arg0: memref<2x1024xf32, #tpu.memory_space<vmem>>, %arg1: memref<2x1024xf32, #tpu.memory_space<vmem>>) attributes {dimension_semantics = [], scalar_prefetch = 0 : i64, scratch_operands = 0 : i64, tpu.core_type = #tpu.core_type<tc>} {
    %c0 = arith.constant 0 : index
    %c0_0 = arith.constant 0 : index
    %0 = vector.load %arg0[%c0, %c0_0] : memref<2x1024xf32, #tpu.memory_space<vmem>>, vector<2x1024xf32>
    %cst = arith.constant 1.000000e+00 : f32
    %1 = vector.broadcast %cst : f32 to vector<2x1024xf32>
    %2 = arith.mulf %1, %0 : vector<2x1024xf32>
    %cst_1 = arith.constant -1.000000e+00 : f32
    %cst_2 = arith.constant 1.000000e+00 : f32
    %3 = vector.broadcast %cst_1 : f32 to vector<2x1024xf32>
    %4 = arith.maximumf %3, %2 : vector<2x1024xf32>
    %5 = vector.broadcast %cst_2 : f32 to vector<2x1024xf32>
    %6 = arith.minimumf %5, %4 : vector<2x1024xf32>
    %c0_3 = arith.constant 0 : index
    %c0_4 = arith.constant 0 : index
    %7 = vector.load %arg1[%c0_3, %c0_4] : memref<2x1024xf32, #tpu.memory_space<vmem>>, vector<2x1024xf32>
    tpu.vector_store %arg1[%c0_3, %c0_4], %6 {strides = array<i32>} : memref<2x1024xf32, #tpu.memory_space<vmem>>, vector<2x1024xf32>,
    return
  }
}

</mosaic_0001>

<bundles_post_ra>
// kernel: run.14
= control target key start
LH: loop header
LB: loop body
LE: loop exit
PB: predicated region body
PF: predicated region fallthrough
CT: control target
= control target key end

     0   :  { %s80_s0 = inlined_call_operand.vmem [shape: f32[2,1024], index: 0, kind: input, shape index: {}, may-alias: {0,3}]   ;;  %s81_s1 = inlined_call_operand.vmem [shape: f32[2,1024], index: 1, kind: input, shape index: {}]   ;;  %s82_s2 = inlined_call_operand.vmem [shape: f32[2,1024], index: 2, kind: input, shape index: {}]   ;;  %s83_s3 = inlined_call_operand.vmem [shape: f32[2,1024], index: 3, kind: output, shape index: {}, may-alias: {0,3}]  }
   0x1   :  { %v14_v0 = vld [vmem:[%s80_s0] sm:$0xff]  ;;  %v15_v6 = vld [vmem:[%s80_s0 + $0x8] sm:$0xff] }
   0x2   :  { %v18_v1 = vld [vmem:[%s81_s1] sm:$0xff]  ;;  %v16_v3 = vmul.f32 0.46231914, %v14_v0  ;;  %v19_v7 = vld [vmem:[%s81_s1 + $0x8] sm:$0xff]  ;;  %v17_v10 = vmul.f32 0.46231914, %v15_v6 }
   0x3   :  { %v24_v2 = vld [vmem:[%s82_s2] sm:$0xff]  ;;  %v20_v4 = vmul.f32 0.53768086, %v18_v1  ;;  %v25_v8 = vld [vmem:[%s82_s2 + $0x8] sm:$0xff]  ;;  %v21_v11 = vmul.f32 0.53768086, %v19_v7 }
   0x4   :  { %v26_v5 = vmul.f32 3.0957677, %v24_v2  ;;  %v27_v12 = vmul.f32 3.0957677, %v25_v8 }
   0x5   :  { %v22_v9 = vadd.f32 %v20_v4, %v16_v3  ;;  %v23_v14 = vadd.f32 %v21_v11, %v17_v10 }
   0x7   :  { %v28_v13 = vadd.f32 %v26_v5, %v22_v9  ;;  %v29_v15 = vadd.f32 %v27_v12, %v23_v14 }
   0x9   :  { %30 = vst [vmem:[%s83_s3] sm:$0xff] %v28_v13  ;;  %31 = vst [vmem:[%s83_s3 + $0x8] sm:$0xff] %v29_v15 }

// kernel: run.15
= control target key start
LH: loop header
LB: loop body
LE: loop exit
PB: predicated region body
PF: predicated region fallthrough
CT: control target
= control target key end

     0   :  { %s80_s0 = inlined_call_operand.vmem [shape: f32[2,1024], index: 0, kind: input, shape index: {}]   ;;  %s81_s1 = inlined_call_operand.vmem [shape: f32[2,1024], index: 1, kind: input, shape index: {}]   ;;  %s82_s2 = inlined_call_operand.vmem [shape: f32[2,1024], index: 2, kind: input, shape index: {}]   ;;  %s83_s3 = inlined_call_operand.vmem [shape: f32[2,1024], index: 3, kind: output, shape index: {}]  }
   0x1   :  { %v14_v0 = vld [vmem:[%s80_s0] sm:$0xff]  ;;  %v15_v6 = vld [vmem:[%s80_s0 + $0x8] sm:$0xff] }
   0x2   :  { %v18_v1 = vld [vmem:[%s81_s1] sm:$0xff]  ;;  %v16_v3 = vmul.f32 0.49925175, %v14_v0  ;;  %v19_v7 = vld [vmem:[%s81_s1 + $0x8] sm:$0xff]  ;;  %v17_v10 = vmul.f32 0.49925175, %v15_v6 }
   0x3   :  { %v24_v2 = vld [vmem:[%s82_s2] sm:$0xff]  ;;  %v20_v4 = vmul.f32 0.5007482, %v18_v1  ;;  %v25_v8 = vld [vmem:[%s82_s2 + $0x8] sm:$0xff]  ;;  %v21_v11 = vmul.f32 0.5007482, %v19_v7 }
   0x4   :  { %v26_v5 = vmul.f32 2.93412, %v24_v2  ;;  %v27_v12 = vmul.f32 2.93412, %v25_v8 }
   0x5   :  { %v22_v9 = vadd.f32 %v20_v4, %v16_v3  ;;  %v23_v14 = vadd.f32 %v21_v11, %v17_v10 }
   0x7   :  { %v28_v13 = vadd.f32 %v26_v5, %v22_v9  ;;  %v29_v15 = vadd.f32 %v27_v12, %v23_v14 }
   0x9   :  { %30 = vst [vmem:[%s83_s3] sm:$0xff] %v28_v13  ;;  %31 = vst [vmem:[%s83_s3 + $0x8] sm:$0xff] %v29_v15 }

// kernel: run.13
= control target key start
LH: loop header
LB: loop body
LE: loop exit
PB: predicated region body
PF: predicated region fallthrough
CT: control target
= control target key end

     0   :  { %s80_s0 = inlined_call_operand.vmem [shape: f32[2,1024], index: 0, kind: input, shape index: {}]   ;;  %s81_s1 = inlined_call_operand.vmem [shape: f32[2,1024], index: 1, kind: input, shape index: {}]   ;;  %s82_s2 = inlined_call_operand.vmem [shape: f32[2,1024], index: 2, kind: input, shape index: {}]   ;;  %s83_s3 = inlined_call_operand.vmem [shape: f32[2,1024], index: 3, kind: output, shape index: {}]  }
   0x1   :  { %v14_v0 = vld [vmem:[%s80_s0] sm:$0xff]  ;;  %v15_v6 = vld [vmem:[%s80_s0 + $0x8] sm:$0xff] }
   0x2   :  { %v18_v1 = vld [vmem:[%s81_s1] sm:$0xff]  ;;  %v16_v3 = vmul.f32 0.49680927, %v14_v0  ;;  %v19_v7 = vld [vmem:[%s81_s1 + $0x8] sm:$0xff]  ;;  %v17_v10 = vmul.f32 0.49680927, %v15_v6 }
   0x3   :  { %v24_v2 = vld [vmem:[%s82_s2] sm:$0xff]  ;;  %v20_v4 = vmul.f32 0.5031907, %v18_v1  ;;  %v25_v8 = vld [vmem:[%s82_s2 + $0x8] sm:$0xff]  ;;  %v21_v11 = vmul.f32 0.5031907, %v19_v7 }
   0x4   :  { %v26_v5 = vmul.f32 5.5639625, %v24_v2  ;;  %v27_v12 = vmul.f32 5.5639625, %v25_v8 }
   0x5   :  { %v22_v9 = vadd.f32 %v20_v4, %v16_v3  ;;  %v23_v14 = vadd.f32 %v21_v11, %v17_v10 }
   0x7   :  { %v28_v13 = vadd.f32 %v26_v5, %v22_v9  ;;  %v29_v15 = vadd.f32 %v27_v12, %v23_v14 }
   0x9   :  { %30 = vst [vmem:[%s83_s3] sm:$0xff] %v28_v13  ;;  %31 = vst [vmem:[%s83_s3 + $0x8] sm:$0xff] %v29_v15 }

// kernel: run.16
= control target key start
LH: loop header
LB: loop body
LE: loop exit
PB: predicated region body
PF: predicated region fallthrough
CT: control target
= control target key end

     0   :  { %s80_s0 = inlined_call_operand.vmem [shape: f32[2,1024], index: 0, kind: input, shape index: {}, may-alias: {0,3}]   ;;  %s81_s1 = inlined_call_operand.vmem [shape: f32[2,1024], index: 1, kind: input, shape index: {}]   ;;  %s82_s2 = inlined_call_operand.vmem [shape: f32[2,1024], index: 2, kind: input, shape index: {}]   ;;  %s83_s3 = inlined_call_operand.vmem [shape: f32[2,1024], index: 3, kind: output, shape index: {}, may-alias: {0,3}]  }
   0x1   :  { %v14_v0 = vld [vmem:[%s80_s0] sm:$0xff]  ;;  %v15_v6 = vld [vmem:[%s80_s0 + $0x8] sm:$0xff] }
   0x2   :  { %v18_v1 = vld [vmem:[%s81_s1] sm:$0xff]  ;;  %v16_v3 = vmul.f32 0.4480586, %v14_v0  ;;  %v19_v7 = vld [vmem:[%s81_s1 + $0x8] sm:$0xff]  ;;  %v17_v10 = vmul.f32 0.4480586, %v15_v6 }
   0x3   :  { %v24_v2 = vld [vmem:[%s82_s2] sm:$0xff]  ;;  %v20_v4 = vmul.f32 0.5519414, %v18_v1  ;;  %v25_v8 = vld [vmem:[%s82_s2 + $0x8] sm:$0xff]  ;;  %v21_v11 = vmul.f32 0.5519414, %v19_v7 }
   0x4   :  { %v26_v5 = vmul.f32 1.5472895, %v24_v2  ;;  %v27_v12 = vmul.f32 1.5472895, %v25_v8 }
   0x5   :  { %v22_v9 = vadd.f32 %v20_v4, %v16_v3  ;;  %v23_v14 = vadd.f32 %v21_v11, %v17_v10 }
   0x7   :  { %v28_v13 = vadd.f32 %v26_v5, %v22_v9  ;;  %v29_v15 = vadd.f32 %v27_v12, %v23_v14 }
   0x9   :  { %30 = vst [vmem:[%s83_s3] sm:$0xff] %v28_v13  ;;  %31 = vst [vmem:[%s83_s3 + $0x8] sm:$0xff] %v29_v15 }

// kernel: run.17
= control target key start
LH: loop header
LB: loop body
LE: loop exit
PB: predicated region body
PF: predicated region fallthrough
CT: control target
= control target key end

     0   :  { %s80_s0 = inlined_call_operand.vmem [shape: f32[2,1024], index: 0, kind: input, shape index: {}]   ;;  %s81_s1 = inlined_call_operand.vmem [shape: f32[2,1024], index: 1, kind: input, shape index: {}]   ;;  %s82_s2 = inlined_call_operand.vmem [shape: f32[2,1024], index: 2, kind: input, shape index: {}]   ;;  %s83_s3 = inlined_call_operand.vmem [shape: f32[2,1024], index: 3, kind: output, shape index: {}]  }
   0x1   :  { %v14_v0 = vld [vmem:[%s80_s0] sm:$0xff]  ;;  %v15_v6 = vld [vmem:[%s80_s0 + $0x8] sm:$0xff] }
   0x2   :  { %v18_v1 = vld [vmem:[%s81_s1] sm:$0xff]  ;;  %v16_v3 = vmul.f32 0.49996904, %v14_v0  ;;  %v19_v7 = vld [vmem:[%s81_s1 + $0x8] sm:$0xff]  ;;  %v17_v10 = vmul.f32 0.49996904, %v15_v6 }
   0x3   :  { %v24_v2 = vld [vmem:[%s82_s2] sm:$0xff]  ;;  %v20_v4 = vmul.f32 0.500031, %v18_v1  ;;  %v25_v8 = vld [vmem:[%s82_s2 + $0x8] sm:$0xff]  ;;  %v21_v11 = vmul.f32 0.500031, %v19_v7 }
   0x4   :  { %v26_v5 = vmul.f32 1.4507321, %v24_v2  ;;  %v27_v12 = vmul.f32 1.4507321, %v25_v8 }
   0x5   :  { %v22_v9 = vadd.f32 %v20_v4, %v16_v3  ;;  %v23_v14 = vadd.f32 %v21_v11, %v17_v10 }
   0x7   :  { %v28_v13 = vadd.f32 %v26_v5, %v22_v9  ;;  %v29_v15 = vadd.f32 %v27_v12, %v23_v14 }
   0x9   :  { %30 = vst [vmem:[%s83_s3] sm:$0xff] %v28_v13  ;;  %31 = vst [vmem:[%s83_s3 + $0x8] sm:$0xff] %v29_v15 }

// kernel: run.18
= control target key start
LH: loop header
LB: loop body
LE: loop exit
PB: predicated region body
PF: predicated region fallthrough
CT: control target
= control target key end

     0   :  { %s80_s0 = inlined_call_operand.vmem [shape: f32[2,1024], index: 0, kind: input, shape index: {}, may-alias: {0,3}]   ;;  %s81_s1 = inlined_call_operand.vmem [shape: f32[2,1024], index: 1, kind: input, shape index: {}]   ;;  %s82_s2 = inlined_call_operand.vmem [shape: f32[2,1024], index: 2, kind: input, shape index: {}]   ;;  %s83_s3 = inlined_call_operand.vmem [shape: f32[2,1024], index: 3, kind: output, shape index: {}, may-alias: {0,3}]  }
   0x1   :  { %v14_v0 = vld [vmem:[%s80_s0] sm:$0xff]  ;;  %v15_v6 = vld [vmem:[%s80_s0 + $0x8] sm:$0xff] }
   0x2   :  { %v18_v1 = vld [vmem:[%s81_s1] sm:$0xff]  ;;  %v16_v3 = vmul.f32 0.42977023, %v14_v0  ;;  %v19_v7 = vld [vmem:[%s81_s1 + $0x8] sm:$0xff]  ;;  %v17_v10 = vmul.f32 0.42977023, %v15_v6 }
   0x3   :  { %v24_v2 = vld [vmem:[%s82_s2] sm:$0xff]  ;;  %v20_v4 = vmul.f32 0.57022977, %v18_v1  ;;  %v25_v8 = vld [vmem:[%s82_s2 + $0x8] sm:$0xff]  ;;  %v21_v11 = vmul.f32 0.57022977, %v19_v7 }
   0x4   :  { %v26_v5 = vmul.f32 0.71729296, %v24_v2  ;;  %v27_v12 = vmul.f32 0.71729296, %v25_v8 }
   0x5   :  { %v22_v9 = vadd.f32 %v20_v4, %v16_v3  ;;  %v23_v14 = vadd.f32 %v21_v11, %v17_v10 }
   0x7   :  { %v28_v13 = vadd.f32 %v26_v5, %v22_v9  ;;  %v29_v15 = vadd.f32 %v27_v12, %v23_v14 }
   0x9   :  { %30 = vst [vmem:[%s83_s3] sm:$0xff] %v28_v13  ;;  %31 = vst [vmem:[%s83_s3 + $0x8] sm:$0xff] %v29_v15 }

// kernel: run.19
= control target key start
LH: loop header
LB: loop body
LE: loop exit
PB: predicated region body
PF: predicated region fallthrough
CT: control target
= control target key end

     0   :  { %s80_s0 = inlined_call_operand.vmem [shape: f32[2,1024], index: 0, kind: input, shape index: {}]   ;;  %s81_s1 = inlined_call_operand.vmem [shape: f32[2,1024], index: 1, kind: input, shape index: {}]   ;;  %s82_s2 = inlined_call_operand.vmem [shape: f32[2,1024], index: 2, kind: input, shape index: {}]   ;;  %s83_s3 = inlined_call_operand.vmem [shape: f32[2,1024], index: 3, kind: output, shape index: {}]  }
   0x1   :  { %v14_v0 = vld [vmem:[%s80_s0] sm:$0xff]  ;;  %v15_v6 = vld [vmem:[%s80_s0 + $0x8] sm:$0xff] }
   0x2   :  { %v18_v1 = vld [vmem:[%s81_s1] sm:$0xff]  ;;  %v16_v3 = vmul.f32 0.49814168, %v14_v0  ;;  %v19_v7 = vld [vmem:[%s81_s1 + $0x8] sm:$0xff]  ;;  %v17_v10 = vmul.f32 0.49814168, %v15_v6 }
   0x3   :  { %v24_v2 = vld [vmem:[%s82_s2] sm:$0xff]  ;;  %v20_v4 = vmul.f32 0.5018583, %v18_v1  ;;  %v25_v8 = vld [vmem:[%s82_s2 + $0x8] sm:$0xff]  ;;  %v21_v11 = vmul.f32 0.5018583, %v19_v7 }
   0x4   :  { %v26_v5 = vmul.f32 0.66288584, %v24_v2  ;;  %v27_v12 = vmul.f32 0.66288584, %v25_v8 }
   0x5   :  { %v22_v9 = vadd.f32 %v20_v4, %v16_v3  ;;  %v23_v14 = vadd.f32 %v21_v11, %v17_v10 }
   0x7   :  { %v28_v13 = vadd.f32 %v26_v5, %v22_v9  ;;  %v29_v15 = vadd.f32 %v27_v12, %v23_v14 }
   0x9   :  { %30 = vst [vmem:[%s83_s3] sm:$0xff] %v28_v13  ;;  %31 = vst [vmem:[%s83_s3 + $0x8] sm:$0xff] %v29_v15 }

// kernel: run.20
= control target key start
LH: loop header
LB: loop body
LE: loop exit
PB: predicated region body
PF: predicated region fallthrough
CT: control target
= control target key end

     0   :  { %s80_s0 = inlined_call_operand.vmem [shape: f32[2,1024], index: 0, kind: input, shape index: {}, may-alias: {0,3}]   ;;  %s81_s1 = inlined_call_operand.vmem [shape: f32[2,1024], index: 1, kind: input, shape index: {}]   ;;  %s82_s2 = inlined_call_operand.vmem [shape: f32[2,1024], index: 2, kind: input, shape index: {}]   ;;  %s83_s3 = inlined_call_operand.vmem [shape: f32[2,1024], index: 3, kind: output, shape index: {}, may-alias: {0,3}]  }
   0x1   :  { %v14_v0 = vld [vmem:[%s80_s0] sm:$0xff]  ;;  %v15_v6 = vld [vmem:[%s80_s0 + $0x8] sm:$0xff] }
   0x2   :  { %v18_v1 = vld [vmem:[%s81_s1] sm:$0xff]  ;;  %v16_v3 = vmul.f32 0.40644172, %v14_v0  ;;  %v19_v7 = vld [vmem:[%s81_s1 + $0x8] sm:$0xff]  ;;  %v17_v10 = vmul.f32 0.40644172, %v15_v6 }
   0x3   :  { %v24_v2 = vld [vmem:[%s82_s2] sm:$0xff]  ;;  %v20_v4 = vmul.f32 0.59355825, %v18_v1  ;;  %v25_v8 = vld [vmem:[%s82_s2 + $0x8] sm:$0xff]  ;;  %v21_v11 = vmul.f32 0.59355825, %v19_v7 }
   0x4   :  { %v26_v5 = vmul.f32 0.30289373, %v24_v2  ;;  %v27_v12 = vmul.f32 0.30289373, %v25_v8 }
   0x5   :  { %v22_v9 = vadd.f32 %v20_v4, %v16_v3  ;;  %v23_v14 = vadd.f32 %v21_v11, %v17_v10 }
   0x7   :  { %v28_v13 = vadd.f32 %v26_v5, %v22_v9  ;;  %v29_v15 = vadd.f32 %v27_v12, %v23_v14 }
   0x9   :  { %30 = vst [vmem:[%s83_s3] sm:$0xff] %v28_v13  ;;  %31 = vst [vmem:[%s83_s3 + $0x8] sm:$0xff] %v29_v15 }

// kernel: run.21
= control target key start
LH: loop header
LB: loop body
LE: loop exit
PB: predicated region body
PF: predicated region fallthrough
CT: control target
= control target key end

     0   :  { %s80_s0 = inlined_call_operand.vmem [shape: f32[2,1024], index: 0, kind: input, shape index: {}]   ;;  %s81_s1 = inlined_call_operand.vmem [shape: f32[2,1024], index: 1, kind: input, shape index: {}]   ;;  %s82_s2 = inlined_call_operand.vmem [shape: f32[2,1024], index: 2, kind: input, shape index: {}]   ;;  %s83_s3 = inlined_call_operand.vmem [shape: f32[2,1024], index: 3, kind: output, shape index: {}]  }
   0x1   :  { %v14_v0 = vld [vmem:[%s80_s0] sm:$0xff]  ;;  %v15_v6 = vld [vmem:[%s80_s0 + $0x8] sm:$0xff] }
   0x2   :  { %v18_v1 = vld [vmem:[%s81_s1] sm:$0xff]  ;;  %v16_v3 = vmul.f32 0.49253863, %v14_v0  ;;  %v19_v7 = vld [vmem:[%s81_s1 + $0x8] sm:$0xff]  ;;  %v17_v10 = vmul.f32 0.49253863, %v15_v6 }
   0x3   :  { %v24_v2 = vld [vmem:[%s82_s2] sm:$0xff]  ;;  %v20_v4 = vmul.f32 0.50746137, %v18_v1  ;;  %v25_v8 = vld [vmem:[%s82_s2 + $0x8] sm:$0xff]  ;;  %v21_v11 = vmul.f32 0.50746137, %v19_v7 }
   0x4   :  { %v26_v5 = vmul.f32 0.27439737, %v24_v2  ;;  %v27_v12 = vmul.f32 0.27439737, %v25_v8 }
   0x5   :  { %v22_v9 = vadd.f32 %v20_v4, %v16_v3  ;;  %v23_v14 = vadd.f32 %v21_v11, %v17_v10 }
   0x7   :  { %v28_v13 = vadd.f32 %v26_v5, %v22_v9  ;;  %v29_v15 = vadd.f32 %v27_v12, %v23_v14 }
   0x9   :  { %30 = vst [vmem:[%s83_s3] sm:$0xff] %v28_v13  ;;  %31 = vst [vmem:[%s83_s3 + $0x8] sm:$0xff] %v29_v15 }

// kernel: run.22
= control target key start
LH: loop header
LB: loop body
LE: loop exit
PB: predicated region body
PF: predicated region fallthrough
CT: control target
= control target key end

     0   :  { %s80_s0 = inlined_call_operand.vmem [shape: f32[2,1024], index: 0, kind: input, shape index: {}, may-alias: {0,3}]   ;;  %s81_s1 = inlined_call_operand.vmem [shape: f32[2,1024], index: 1, kind: input, shape index: {}]   ;;  %s82_s2 = inlined_call_operand.vmem [shape: f32[2,1024], index: 2, kind: input, shape index: {}]   ;;  %s83_s3 = inlined_call_operand.vmem [shape: f32[2,1024], index: 3, kind: output, shape index: {}, may-alias: {0,3}]  }
   0x1   :  { %v14_v0 = vld [vmem:[%s80_s0] sm:$0xff]  ;;  %v15_v6 = vld [vmem:[%s80_s0 + $0x8] sm:$0xff] }
   0x2   :  { %v18_v1 = vld [vmem:[%s81_s1] sm:$0xff]  ;;  %v16_v3 = vmul.f32 0.37681392, %v14_v0  ;;  %v19_v7 = vld [vmem:[%s81_s1 + $0x8] sm:$0xff]  ;;  %v17_v10 = vmul.f32 0.37681392, %v15_v6 }
   0x3   :  { %v24_v2 = vld [vmem:[%s82_s2] sm:$0xff]  ;;  %v20_v4 = vmul.f32 0.62318605, %v18_v1  ;;  %v25_v8 = vld [vmem:[%s82_s2 + $0x8] sm:$0xff]  ;;  %v21_v11 = vmul.f32 0.62318605, %v19_v7 }
   0x4   :  { %v26_v5 = vmul.f32 0.11358505, %v24_v2  ;;  %v27_v12 = vmul.f32 0.11358505, %v25_v8 }
   0x5   :  { %v22_v9 = vadd.f32 %v20_v4, %v16_v3  ;;  %v23_v14 = vadd.f32 %v21_v11, %v17_v10 }
   0x7   :  { %v28_v13 = vadd.f32 %v26_v5, %v22_v9  ;;  %v29_v15 = vadd.f32 %v27_v12, %v23_v14 }
   0x9   :  { %30 = vst [vmem:[%s83_s3] sm:$0xff] %v28_v13  ;;  %31 = vst [vmem:[%s83_s3 + $0x8] sm:$0xff] %v29_v15 }

// kernel: run.23
= control target key start
LH: loop header
LB: loop body
LE: loop exit
PB: predicated region body
PF: predicated region fallthrough
CT: control target
= control target key end

     0   :  { %s80_s0 = inlined_call_operand.vmem [shape: f32[2,1024], index: 0, kind: input, shape index: {}]   ;;  %s81_s1 = inlined_call_operand.vmem [shape: f32[2,1024], index: 1, kind: input, shape index: {}]   ;;  %s82_s2 = inlined_call_operand.vmem [shape: f32[2,1024], index: 2, kind: input, shape index: {}]   ;;  %s83_s3 = inlined_call_operand.vmem [shape: f32[2,1024], index: 3, kind: output, shape index: {}]  }
   0x1   :  { %v14_v0 = vld [vmem:[%s80_s0] sm:$0xff]  ;;  %v15_v6 = vld [vmem:[%s80_s0 + $0x8] sm:$0xff] }
   0x2   :  { %v18_v1 = vld [vmem:[%s81_s1] sm:$0xff]  ;;  %v16_v3 = vmul.f32 0.48127136, %v14_v0  ;;  %v19_v7 = vld [vmem:[%s81_s1 + $0x8] sm:$0xff]  ;;  %v17_v10 = vmul.f32 0.48127136, %v15_v6 }
   0x3   :  { %v24_v2 = vld [vmem:[%s82_s2] sm:$0xff]  ;;  %v20_v4 = vmul.f32 0.5187286, %v18_v1  ;;  %v25_v8 = vld [vmem:[%s82_s2 + $0x8] sm:$0xff]  ;;  %v21_v11 = vmul.f32 0.5187286, %v19_v7 }
   0x4   :  { %v26_v5 = vmul.f32 0.1, %v24_v2  ;;  %v27_v12 = vmul.f32 0.1, %v25_v8 }
   0x5   :  { %v22_v9 = vadd.f32 %v20_v4, %v16_v3  ;;  %v23_v14 = vadd.f32 %v21_v11, %v17_v10 }
   0x7   :  { %v28_v13 = vadd.f32 %v26_v5, %v22_v9  ;;  %v29_v15 = vadd.f32 %v27_v12, %v23_v14 }
   0x9   :  { %30 = vst [vmem:[%s83_s3] sm:$0xff] %v28_v13  ;;  %31 = vst [vmem:[%s83_s3 + $0x8] sm:$0xff] %v29_v15 }

// kernel: run.24
= control target key start
LH: loop header
LB: loop body
LE: loop exit
PB: predicated region body
PF: predicated region fallthrough
CT: control target
= control target key end

     0   :  { %s80_s0 = inlined_call_operand.vmem [shape: f32[2,1024], index: 0, kind: input, shape index: {}, may-alias: {0,3}]   ;;  %s81_s1 = inlined_call_operand.vmem [shape: f32[2,1024], index: 1, kind: input, shape index: {}]   ;;  %s82_s2 = inlined_call_operand.vmem [shape: f32[2,1024], index: 2, kind: input, shape index: {}]   ;;  %s83_s3 = inlined_call_operand.vmem [shape: f32[2,1024], index: 3, kind: output, shape index: {}, may-alias: {0,3}]  }
   0x1   :  { %v14_v0 = vld [vmem:[%s80_s0] sm:$0xff]  ;;  %v15_v6 = vld [vmem:[%s80_s0 + $0x8] sm:$0xff] }
   0x2   :  { %v18_v1 = vld [vmem:[%s81_s1] sm:$0xff]  ;;  %v16_v3 = vmul.f32 0.33937237, %v14_v0  ;;  %v19_v7 = vld [vmem:[%s81_s1 + $0x8] sm:$0xff]  ;;  %v17_v10 = vmul.f32 0.33937237, %v15_v6 }
   0x3   :  { %v24_v2 = vld [vmem:[%s82_s2] sm:$0xff]  ;;  %v20_v4 = vmul.f32 0.66062766, %v18_v1  ;;  %v25_v8 = vld [vmem:[%s82_s2 + $0x8] sm:$0xff]  ;;  %v21_v11 = vmul.f32 0.66062766, %v19_v7 }
   0x4   :  { %v26_v5 = vmul.f32 0.036443498, %v24_v2  ;;  %v27_v12 = vmul.f32 0.036443498, %v25_v8 }
   0x5   :  { %v22_v9 = vadd.f32 %v20_v4, %v16_v3  ;;  %v23_v14 = vadd.f32 %v21_v11, %v17_v10 }
   0x7   :  { %v28_v13 = vadd.f32 %v26_v5, %v22_v9  ;;  %v29_v15 = vadd.f32 %v27_v12, %v23_v14 }
   0x9   :  { %30 = vst [vmem:[%s83_s3] sm:$0xff] %v28_v13  ;;  %31 = vst [vmem:[%s83_s3 + $0x8] sm:$0xff] %v29_v15 }

// kernel: run.25
= control target key start
LH: loop header
LB: loop body
LE: loop exit
PB: predicated region body
PF: predicated region fallthrough
CT: control target
= control target key end

     0   :  { %s44_s0 = inlined_call_operand.vmem [shape: f32[2,1024], index: 0, kind: input, shape index: {}, may-alias: {0,1}]   ;;  %s45_s1 = inlined_call_operand.vmem [shape: f32[2,1024], index: 1, kind: output, shape index: {}, may-alias: {0,1}]  }
   0x1   :  { %v8_v0 = vld [vmem:[%s44_s0] sm:$0xff]  ;;  %v9_v1 = vld [vmem:[%s44_s0 + $0x8] sm:$0xff] }
   0x2   :  { %v20_v2 = vclamps-f32 %v8_v0, 1.0  ;;  %v21_v3 = vclamps-f32 %v9_v1, 1.0 }
   0x4   :  { %14 = vst [vmem:[%s45_s1] sm:$0xff] %v20_v2  ;;  %15 = vst [vmem:[%s45_s1 + $0x8] sm:$0xff] %v21_v3 }

</bundles_post_ra>
